<compile_context>
chip_gen: v6e
topology: v6e:2x2x1
jax: 0.10.0
libtpu: 0.0.40
codegen_flags: <defaults>
</compile_context>

<pallas_src>
import math
import functools

import jax
import jax.numpy as jnp
from jax.experimental import pallas as pl
from jax.experimental.pallas import tpu as pltpu

NEG_INF_FILL = -1000000000.0  # matches masked_fill(mask == 0, -1e9)


# ----------------------------- Pallas kernels -----------------------------

def qkv_proj_kernel(x_ref, w_ref, b_ref, q_ref, k_ref, v_ref):
    """x @ Wq|Wk|Wv + bq|bk|bv for one (row-tile, col-tile); weights are [3, D, bn]."""
    x = x_ref[...].astype(w_ref.dtype)                 # bf16 operands for the MXU
    for idx, o_ref in enumerate((q_ref, k_ref, v_ref)):
        acc = jnp.dot(x, w_ref[idx], preferred_element_type=jnp.float32)
        o_ref[...] = (acc + b_ref[idx]).astype(o_ref.dtype)


def linear_kernel(x_ref, w_ref, b_ref, o_ref):
    x = x_ref[...].astype(w_ref.dtype)                 # bf16 operands for the MXU
    acc = jnp.dot(x, w_ref[...], preferred_element_type=jnp.float32) + b_ref[...]
    o_ref[...] = acc.astype(o_ref.dtype)


def flash_attn_kernel(q_ref, k_ref, v_ref, *rest,
                      sm_scale, block_q, block_k, causal, has_bias):
    """Online-softmax attention for one (batch, head, q-tile); kv-tiles on grid axis 3."""
    if has_bias:
        bias_ref = rest[0]
        rest = rest[1:]
    o_ref, m_sc, l_sc, acc_sc = rest

    iq = pl.program_id(2)
    ik = pl.program_id(3)

    @pl.when(ik == 0)
    def _():
        m_sc[...] = jnp.full_like(m_sc, -jnp.inf)
        l_sc[...] = jnp.zeros_like(l_sc)
        acc_sc[...] = jnp.zeros_like(acc_sc)

    def compute():
        # bf16 q/k/v on the MXU, f32 accumulation
        s = jax.lax.dot_general(q_ref[...], k_ref[...], (((1,), (1,)), ((), ())),
                                preferred_element_type=jnp.float32)    # [tq, tk]
        s = s * sm_scale                                 # scale f32 scores (precision)
        if has_bias:
            s = s + bias_ref[...]                        # additive bf16 bias: 0 / -1e9
        if causal:
            q_ids = iq * block_q + jax.lax.broadcasted_iota(jnp.int32, s.shape, 0)
            k_ids = ik * block_k + jax.lax.broadcasted_iota(jnp.int32, s.shape, 1)
            s = jnp.where(q_ids >= k_ids, s, NEG_INF_FILL)

        m_prev = m_sc[...]
        m_new = jnp.maximum(m_prev, jnp.max(s, axis=-1, keepdims=True))
        alpha = jnp.exp(m_prev - m_new)
        p = jnp.exp(s - m_new)
        l_sc[...] = alpha * l_sc[...] + jnp.sum(p, axis=-1, keepdims=True)
        acc_sc[...] = alpha * acc_sc[...] + jnp.dot(
            p.astype(v_ref.dtype), v_ref[...], preferred_element_type=jnp.float32)
        m_sc[...] = m_new

    if causal:
        # skip kv tiles that are entirely above the diagonal for this q tile
        @pl.when(ik * block_k <= iq * block_q + (block_q - 1))
        def _():
            compute()
    else:
        compute()

    # TODO(synk): attention dropout (p=0.1) omitted — eval / deterministic inference.
    @pl.when(ik == pl.num_programs(3) - 1)
    def _():
        o_ref[...] = (acc_sc[...] * pl.reciprocal(l_sc[...], approx=True)).astype(o_ref.dtype)


# ----------------------------- Pallas wrappers -----------------------------

_VMEM_LIMIT = 64 * 1024 * 1024


def qkv_proj(x2d, wqkv, bqkv, *, out_dtype=jnp.bfloat16, block_rows=512, block_cols=512):
    """Fused Q/K/V projection. x2d: [M, D] (f32 ok); wqkv: [3, D, D] bf16; bqkv: [3, 1, D] f32."""
    M, D = x2d.shape
    bm = min(block_rows, M)
    bn = min(block_cols, D)
    out = jax.ShapeDtypeStruct((M, D), out_dtype)
    # TODO(synk): for very large D, also tile the K (contraction) dim with an
    # "arbitrary" reduction axis + f32 accumulator scratch.
    return pl.pallas_call(
        qkv_proj_kernel,
        out_shape=(out, out, out),
        grid=(pl.cdiv(M, bm), pl.cdiv(D, bn)),
        in_specs=[
            pl.BlockSpec((bm, D), lambda i, j: (i, 0)),
            pl.BlockSpec((3, D, bn), lambda i, j: (0, 0, j)),   # weight streamed in N tiles
            pl.BlockSpec((3, 1, bn), lambda i, j: (0, 0, j)),
        ],
        out_specs=(
            pl.BlockSpec((bm, bn), lambda i, j: (i, j)),
            pl.BlockSpec((bm, bn), lambda i, j: (i, j)),
            pl.BlockSpec((bm, bn), lambda i, j: (i, j)),
        ),
        compiler_params=pltpu.CompilerParams(
            dimension_semantics=("parallel", "parallel"),
            vmem_limit_bytes=_VMEM_LIMIT),
    )(x2d, wqkv, bqkv)


def linear(x2d, w, b, *, out_dtype=None, block_rows=512, block_cols=512):
    """x2d: [M, K]; w: [K, N] (bf16); b: [N] (f32)."""
    M, K = x2d.shape
    N = w.shape[1]
    bm = min(block_rows, M)
    bn = min(block_cols, N)
    out_dtype = out_dtype or x2d.dtype
    return pl.pallas_call(
        linear_kernel,
        out_shape=jax.ShapeDtypeStruct((M, N), out_dtype),
        grid=(pl.cdiv(M, bm), pl.cdiv(N, bn)),
        in_specs=[
            pl.BlockSpec((bm, K), lambda i, j: (i, 0)),
            pl.BlockSpec((K, bn), lambda i, j: (0, j)),
            pl.BlockSpec((1, bn), lambda i, j: (0, j)),
        ],
        out_specs=pl.BlockSpec((bm, bn), lambda i, j: (i, j)),
        compiler_params=pltpu.CompilerParams(
            dimension_semantics=("parallel", "parallel"),
            vmem_limit_bytes=_VMEM_LIMIT),
    )(x2d, w, b.reshape(1, N))


def flash_attention(q, k, v, bias3, n_heads, *, block_q=512, block_k=512, causal=False):
    """q: [B, Sq, H*Dk]; k, v: [B, Sk, H*Dk]; bias3: [B, Sq, Sk] additive bias or None."""
    B, Sq, D = q.shape
    Sk = k.shape[1]
    assert D % n_heads == 0
    Dk = D // n_heads
    # Head slicing via the index_map wants a lane-aligned head dim (Dk % 128 == 0) or H == 1.
    tq = min(block_q, Sq)
    tk = min(block_k, Sk)
    assert Sk % tk == 0, "pad the kv sequence to a multiple of the kv tile"
    sm_scale = 1.0 / math.sqrt(Dk)
    has_bias = (bias3 is not None) and (not causal)

    kernel = functools.partial(flash_attn_kernel, sm_scale=sm_scale,
                               block_q=tq, block_k=tk, causal=causal, has_bias=has_bias)
    in_specs = [
        pl.BlockSpec((None, tq, Dk), lambda b, h, iq, ik: (b, iq, h)),
        pl.BlockSpec((None, tk, Dk), lambda b, h, iq, ik: (b, ik, h)),
        pl.BlockSpec((None, tk, Dk), lambda b, h, iq, ik: (b, ik, h)),
    ]
    args = [q, k, v]
    if has_bias:
        in_specs.append(pl.BlockSpec((None, tq, tk), lambda b, h, iq, ik: (b, iq, ik)))
        args.append(bias3)

    return pl.pallas_call(
        kernel,
        out_shape=jax.ShapeDtypeStruct((B, Sq, D), q.dtype),
        grid=(B, n_heads, pl.cdiv(Sq, tq), Sk // tk),
        in_specs=in_specs,
        out_specs=pl.BlockSpec((None, tq, Dk), lambda b, h, iq, ik: (b, iq, h)),
        scratch_shapes=[
            pltpu.VMEM((tq, 1), jnp.float32),   # running max
            pltpu.VMEM((tq, 1), jnp.float32),   # running softmax denominator
            pltpu.VMEM((tq, Dk), jnp.float32),  # output accumulator
        ],
        compiler_params=pltpu.CompilerParams(
            dimension_semantics=("parallel", "parallel", "parallel", "arbitrary"),
            vmem_limit_bytes=_VMEM_LIMIT),
    )(*args)


# ----------------------------- model glue (plain JAX) -----------------------------

def multi_head_attention(query, key, value, mask, params, *, causal=False):
    """query: [B, Sq, D]; key/value: [B, Sk, D]; mask broadcastable to [B, Sq, Sk] or None.

    If causal=True the mask argument is ignored and a lower-triangular mask is generated
    in-kernel (no mask HBM traffic, fully-masked kv tiles skipped)."""
    B, Sq, D = query.shape
    Sk = key.shape[1]
    H = params["h"]
    wqkv, bqkv = params["wqkv"], params["bqkv"]        # [3, D, D] bf16, [3, 1, D] f32

    if (query is key) and (key is value):
        # self-attention: one fused pallas_call, x read from HBM once
        q2d, k2d, v2d = qkv_proj(query.reshape(B * Sq, D), wqkv, bqkv)
    else:
        q2d = linear(query.reshape(B * Sq, D), wqkv[0], bqkv[0].reshape(-1),
                     out_dtype=jnp.bfloat16)
        k2d = linear(key.reshape(B * Sk, D), wqkv[1], bqkv[1].reshape(-1),
                     out_dtype=jnp.bfloat16)
        v2d = linear(value.reshape(B * Sk, D), wqkv[2], bqkv[2].reshape(-1),
                     out_dtype=jnp.bfloat16)

    # head-contiguous [B, S, H*Dk] layout — no transposes, heads selected in the kernel
    q = q2d.reshape(B, Sq, D)
    k = k2d.reshape(B, Sk, D)
    v = v2d.reshape(B, Sk, D)

    if causal or mask is None:
        bias3 = None
    else:
        m = jnp.asarray(mask)
        if m.ndim == 4:        # already carries a broadcast head axis
            m = m[:, 0]        # TODO(synk): genuinely per-head masks are not supported
        elif m.ndim == 2:
            m = m[None]
        m = jnp.broadcast_to(m, (B, Sq, Sk))
        # additive bias (0 keep / -1e9 masked) in bf16: half the HBM traffic of an f32
        # mask and a single VPU add in-kernel instead of compare+select
        bias3 = jnp.where(m == 0, NEG_INF_FILL, 0.0).astype(jnp.bfloat16)

    o = flash_attention(q, k, v, bias3, H, causal=causal)      # [B, Sq, D] bf16
    return linear(o.reshape(B * Sq, D), params["wo"], params["bo"],
                  out_dtype=query.dtype).reshape(B, Sq, D)


# ----------------------------- deterministic params & main -----------------------------

def init_params(key, d_model, n_heads):
    assert d_model % n_heads == 0
    ks = jax.random.split(key, 8)

    def lin(kw, kb, din, dout):
        w = jax.random.normal(kw, (din, dout), jnp.float32) * 0.02
        b = jax.random.normal(kb, (dout,), jnp.float32) * 0.02
        return w, b

    wq, bq = lin(ks[0], ks[1], d_model, d_model)
    wk, bk = lin(ks[2], ks[3], d_model, d_model)
    wv, bv = lin(ks[4], ks[5], d_model, d_model)
    wo, bo = lin(ks[6], ks[7], d_model, d_model)
    # bf16 weights: ~2x MXU throughput + half the weight HBM/VMEM footprint; biases f32
    # TODO(synk): optional fp8 weight storage with per-channel scales on v7x.
    return {
        "h": n_heads,
        "wqkv": jnp.stack([wq, wk, wv], axis=0).astype(jnp.bfloat16),       # [3, D, D]
        "bqkv": jnp.stack([bq, bk, bv], axis=0).reshape(3, 1, d_model),     # [3, 1, D]
        "wo": wo.astype(jnp.bfloat16),
        "bo": bo,
    }


if __name__ == "__main__":
    # small but TPU-friendly shapes: d_k = 128 keeps every block lane-aligned
    B, S, H, DK = 2, 8, 2, 128
    D = H * DK                                           # d_model = 256
    key = jax.random.PRNGKey(0)
    k_x, k_p = jax.random.split(key)

    x = jax.random.normal(k_x, (B, S, D), jnp.float32)
    # causal (subsequent-position) mask; 0 entries are masked, as in masked_fill(mask == 0)
    mask = jnp.broadcast_to(jnp.tril(jnp.ones((S, S), jnp.float32)), (B, S, S))

    params = init_params(k_p, D, H)

    # general path: explicit mask shipped as a bf16 additive bias
    out = multi_head_attention(x, x, x, mask, params)
    out = jax.block_until_ready(out)
    assert out.shape == (B, S, D) and out.dtype == jnp.float32
    assert bool(jnp.all(jnp.isfinite(out)))

    # causal fast path: in-kernel iota mask, fully-masked kv tiles skipped — must agree
    out_c = jax.block_until_ready(multi_head_attention(x, x, x, None, params, causal=True))
    assert bool(jnp.allclose(out, out_c, atol=5e-2, rtol=5e-2))

    print("KERNEL_OK")
</pallas_src>

<mosaic_0001>
module attributes {stable_mosaic.version = 11 : i64} {
  func.func @qkv_proj_kernel(%arg0: i32, %arg1: i32, %arg2: memref<16x256xf32, #tpu.memory_space<vmem>>, %arg3: memref<3x256x256xbf16, #tpu.memory_space<vmem>>, %arg4: memref<3x1x256xf32, #tpu.memory_space<vmem>>, %arg5: memref<16x256xbf16, #tpu.memory_space<vmem>>, %arg6: memref<16x256xbf16, #tpu.memory_space<vmem>>, %arg7: memref<16x256xbf16, #tpu.memory_space<vmem>>) attributes {dimension_semantics = [#tpu.dimension_semantics<parallel>, #tpu.dimension_semantics<parallel>], iteration_bounds = array<i64: 1, 1>, scalar_prefetch = 0 : i64, scratch_operands = 0 : i64, tpu.core_type = #tpu.core_type<tc>, window_params = [{transform_indices = @transform_0, window_bounds = array<i64: 16, 256>}, {transform_indices = @transform_1, window_bounds = array<i64: 3, 256, 256>}, {transform_indices = @transform_2, window_bounds = array<i64: 3, 1, 256>}, {transform_indices = @transform_3, window_bounds = array<i64: 16, 256>}, {transform_indices = @transform_4, window_bounds = array<i64: 16, 256>}, {transform_indices = @transform_5, window_bounds = array<i64: 16, 256>}]} {
    %c0 = arith.constant 0 : index
    %c0_0 = arith.constant 0 : index
    %0 = vector.load %arg2[%c0, %c0_0] : memref<16x256xf32, #tpu.memory_space<vmem>>, vector<16x256xf32>
    %1 = arith.truncf %0 : vector<16x256xf32> to vector<16x256xbf16>
    %c0_1 = arith.constant 0 : index
    %c0_2 = arith.constant 0 : index
    %c0_3 = arith.constant 0 : index
    %2 = vector.load %arg3[%c0_1, %c0_2, %c0_3] : memref<3x256x256xbf16, #tpu.memory_space<vmem>>, vector<1x256x256xbf16>
    %3 = vector.shape_cast %2 : vector<1x256x256xbf16> to vector<256x256xbf16>
    %cst = arith.constant dense<0.000000e+00> : vector<16x256xf32>
    %4 = tpu.matmul %1, %3, %cst {dimension_numbers = #tpu.dot_dimension_numbers<[1], [0], [0], [1], [0, 0, 1, 1], [], []>} : vector<16x256xbf16>, vector<256x256xbf16>, vector<16x256xf32> -> vector<16x256xf32>
    %c0_4 = arith.constant 0 : index
    %c0_5 = arith.constant 0 : index
    %c0_6 = arith.constant 0 : index
    %5 = vector.load %arg4[%c0_4, %c0_5, %c0_6] : memref<3x1x256xf32, #tpu.memory_space<vmem>>, vector<1x1x256xf32>
    %6 = vector.shape_cast %5 : vector<1x1x256xf32> to vector<1x256xf32>
    %7 = vector.broadcast %6 : vector<1x256xf32> to vector<16x256xf32>
    %8 = arith.addf %4, %7 : vector<16x256xf32>
    %9 = arith.truncf %8 : vector<16x256xf32> to vector<16x256xbf16>
    %c0_7 = arith.constant 0 : index
    %c0_8 = arith.constant 0 : index
    %10 = vector.load %arg5[%c0_7, %c0_8] : memref<16x256xbf16, #tpu.memory_space<vmem>>, vector<16x256xbf16>
    tpu.vector_store %arg5[%c0_7, %c0_8], %9 {strides = array<i32>} : memref<16x256xbf16, #tpu.memory_space<vmem>>, vector<16x256xbf16>,
    %c1 = arith.constant 1 : index
    %c0_9 = arith.constant 0 : index
    %c0_10 = arith.constant 0 : index
    %11 = vector.load %arg3[%c1, %c0_9, %c0_10] : memref<3x256x256xbf16, #tpu.memory_space<vmem>>, vector<1x256x256xbf16>
    %12 = vector.shape_cast %11 : vector<1x256x256xbf16> to vector<256x256xbf16>
    %cst_11 = arith.constant dense<0.000000e+00> : vector<16x256xf32>
    %13 = tpu.matmul %1, %12, %cst_11 {dimension_numbers = #tpu.dot_dimension_numbers<[1], [0], [0], [1], [0, 0, 1, 1], [], []>} : vector<16x256xbf16>, vector<256x256xbf16>, vector<16x256xf32> -> vector<16x256xf32>
    %c1_12 = arith.constant 1 : index
    %c0_13 = arith.constant 0 : index
    %c0_14 = arith.constant 0 : index
    %14 = vector.load %arg4[%c1_12, %c0_13, %c0_14] : memref<3x1x256xf32, #tpu.memory_space<vmem>>, vector<1x1x256xf32>
    %15 = vector.shape_cast %14 : vector<1x1x256xf32> to vector<1x256xf32>
    %16 = vector.broadcast %15 : vector<1x256xf32> to vector<16x256xf32>
    %17 = arith.addf %13, %16 : vector<16x256xf32>
    %18 = arith.truncf %17 : vector<16x256xf32> to vector<16x256xbf16>
    %c0_15 = arith.constant 0 : index
    %c0_16 = arith.constant 0 : index
    %19 = vector.load %arg6[%c0_15, %c0_16] : memref<16x256xbf16, #tpu.memory_space<vmem>>, vector<16x256xbf16>
    tpu.vector_store %arg6[%c0_15, %c0_16], %18 {strides = array<i32>} : memref<16x256xbf16, #tpu.memory_space<vmem>>, vector<16x256xbf16>,
    %c2 = arith.constant 2 : index
    %c0_17 = arith.constant 0 : index
    %c0_18 = arith.constant 0 : index
    %20 = vector.load %arg3[%c2, %c0_17, %c0_18] : memref<3x256x256xbf16, #tpu.memory_space<vmem>>, vector<1x256x256xbf16>
    %21 = vector.shape_cast %20 : vector<1x256x256xbf16> to vector<256x256xbf16>
    %cst_19 = arith.constant dense<0.000000e+00> : vector<16x256xf32>
    %22 = tpu.matmul %1, %21, %cst_19 {dimension_numbers = #tpu.dot_dimension_numbers<[1], [0], [0], [1], [0, 0, 1, 1], [], []>} : vector<16x256xbf16>, vector<256x256xbf16>, vector<16x256xf32> -> vector<16x256xf32>
    %c2_20 = arith.constant 2 : index
    %c0_21 = arith.constant 0 : index
    %c0_22 = arith.constant 0 : index
    %23 = vector.load %arg4[%c2_20, %c0_21, %c0_22] : memref<3x1x256xf32, #tpu.memory_space<vmem>>, vector<1x1x256xf32>
    %24 = vector.shape_cast %23 : vector<1x1x256xf32> to vector<1x256xf32>
    %25 = vector.broadcast %24 : vector<1x256xf32> to vector<16x256xf32>
    %26 = arith.addf %22, %25 : vector<16x256xf32>
    %27 = arith.truncf %26 : vector<16x256xf32> to vector<16x256xbf16>
    %c0_23 = arith.constant 0 : index
    %c0_24 = arith.constant 0 : index
    %28 = vector.load %arg7[%c0_23, %c0_24] : memref<16x256xbf16, #tpu.memory_space<vmem>>, vector<16x256xbf16>
    tpu.vector_store %arg7[%c0_23, %c0_24], %27 {strides = array<i32>} : memref<16x256xbf16, #tpu.memory_space<vmem>>, vector<16x256xbf16>,
    return
  }
  func.func @transform_0(%arg0: i32, %arg1: i32) -> (i32, i32) {
    %c0_i32 = arith.constant 0 : i32
    %c0_i32_0 = arith.constant 0 : i32
    return %arg0, %c0_i32 : i32, i32
  }
  func.func @transform_1(%arg0: i32, %arg1: i32) -> (i32, i32, i32) {
    %c0_i32 = arith.constant 0 : i32
    %c0_i32_0 = arith.constant 0 : i32
    %c0_i32_1 = arith.constant 0 : i32
    return %c0_i32, %c0_i32_0, %arg1 : i32, i32, i32
  }
  func.func @transform_2(%arg0: i32, %arg1: i32) -> (i32, i32, i32) {
    %c0_i32 = arith.constant 0 : i32
    %c0_i32_0 = arith.constant 0 : i32
    %c0_i32_1 = arith.constant 0 : i32
    return %c0_i32, %c0_i32_0, %arg1 : i32, i32, i32
  }
  func.func @transform_3(%arg0: i32, %arg1: i32) -> (i32, i32) {
    %c0_i32 = arith.constant 0 : i32
    return %arg0, %arg1 : i32, i32
  }
  func.func @transform_4(%arg0: i32, %arg1: i32) -> (i32, i32) {
    %c0_i32 = arith.constant 0 : i32
    return %arg0, %arg1 : i32, i32
  }
  func.func @transform_5(%arg0: i32, %arg1: i32) -> (i32, i32) {
    %c0_i32 = arith.constant 0 : i32
    return %arg0, %arg1 : i32, i32
  }
}

</mosaic_0001>

<bundles_post_ra>
// kernel: tpu_custom_call.1
= control target key start
LH: loop header
LB: loop body
LE: loop exit
PB: predicated region body
PF: predicated region fallthrough
CT: control target
= control target key end

     0   :  { %11 = vsyncpa [#allocation3], 0  ;;  %s1376_s0 = inlined_call_operand.hbm [shape: f32[16,256], index: 0, kind: input, shape index: {}]   ;;  %s1377_s1 = inlined_call_operand.hbm [shape: bf16[3,256,256], index: 1, kind: input, shape index: {}]   ;;  %s1378_s2 = inlined_call_operand.hbm [shape: f32[3,1,256], index: 2, kind: input, shape index: {}]   ;;  %s1379_s3 = inlined_call_operand.hbm [shape: bf16[16,256], index: 3, kind: output, shape index: {0}]   ;;  %s1380_s4 = inlined_call_operand.hbm [shape: bf16[16,256], index: 4, kind: output, shape index: {1}]   ;;  %s1381_s5 = inlined_call_operand.hbm [shape: bf16[16,256], index: 5, kind: output, shape index: {2}]  }
   0x1   :  { %12 = vsyncpa [#allocation6], 0 }
   0x2   :  { %13 = vsyncpa [#allocation4], 0 }
   0x3   :  { %14 = vsyncpa [#allocation10], 0  ;;  %s1294_s18 = smov [#allocation5]  }
   0x4   :  { %s32_s19 = sshll.u32 %s1294_s18, 4  ;;  %s33_s19 = int_to_ptr.vmem [resolvable:$true] %s32_s19 }
   0x5   :  { %s1174_s20 = scalar_lea.vmem %s33_s19, 12288  ;;  %p1179_p1 = scmp.lt.s32.totalorder %s33_s19, %s33_s19 }
   0x6   :  { %p1175_p0 = scmp.ne.s32.totalorder %s33_s19, %s1174_s20  ;;  %p1180_p2 = scmp.lt.s32.totalorder %s1174_s20, %s1174_s20 }
   0x8   :  { %p1181_p3 = por %p1180_p2, %p1179_p1 }
   0xa   :  { %p1182_p4 = pnand %p1181_p3, %p1175_p0 }
   0xc   :  { %1185 = shalt.err (!%p1182_p4)
}
   0xd   :  { %s1295_s21 = smov 128   ;;  %s1296_s22 = smov 8  }
   0xe   :  { %38 = dma.hbm_to_vmem [thread:$0]  %s1377_s1, 12288, %s33_s19, [#allocation6], %s1295_s21, %s1295_s21, %s1296_s22  }
   0xf   :  { %s1297_s25 = smov [#allocation2]  }
  0x10   :  { %s20_s26 = sshll.u32 %s1297_s25, 4  ;;  %s21_s26 = int_to_ptr.vmem [resolvable:$true] %s20_s26 }
  0x11   :  { %s1194_s27 = scalar_lea.vmem %s21_s26, 512  ;;  %p1199_p6 = scmp.lt.s32.totalorder %s21_s26, %s21_s26 }
  0x12   :  { %p1195_p5 = scmp.ne.s32.totalorder %s21_s26, %s1194_s27  ;;  %p1200_p7 = scmp.lt.s32.totalorder %s1194_s27, %s1194_s27 }
  0x14   :  { %p1201_p8 = por %p1200_p7, %p1199_p6 }
  0x16   :  { %p1202_p9 = pnand %p1201_p8, %p1195_p5 }
  0x18   :  { %1205 = shalt.err (!%p1202_p9)
}
  0x19   :  { %s1298_s28 = smov 256   ;;  %s1299_s29 = smov 16  }
  0x1a   :  { %26 = dma.hbm_to_vmem [thread:$0]  %s1376_s0, 512, %s21_s26, [#allocation3], %s1298_s28, %s1298_s28, %s1299_s29  }
  0x1b   :  { %s1300_s7 = smov [#allocation7]  }
  0x1c   :  { %s44_s8 = sshll.u32 %s1300_s7, 4  ;;  %s45_s8 = int_to_ptr.vmem [resolvable:$true] %s44_s8 }
  0x1d   :  { %s1214_s1 = scalar_lea.vmem %s45_s8, 96  ;;  %p1219_p11 = scmp.lt.s32.totalorder %s45_s8, %s45_s8 }
  0x1e   :  { %p1215_p10 = scmp.ne.s32.totalorder %s45_s8, %s1214_s1  ;;  %p1220_p12 = scmp.lt.s32.totalorder %s1214_s1, %s1214_s1 }
  0x20   :  { %p1221_p13 = por %p1220_p12, %p1219_p11 }
  0x22   :  { %p1222_p0 = pnand %p1221_p13, %p1215_p10 }
  0x24   :  { %1225 = shalt.err (!%p1222_p0)
}
  0x25   :  { %s1301_s9 = smov 32   ;;  %s1302_s10 = smov 2  }
  0x26   :  { %50 = dma.hbm_to_vmem [thread:$0]  %s1378_s2, 96, %s45_s8, [#allocation6], %s1301_s9, %s1301_s9, %s1302_s10  }
  0x27   :  { %1286 = dma.done.wait [#allocation3], 512  }
  0x28   :  { %1287 = vsyncadd [#allocation3], 4294966784 }
  0x29   :  { %1288 = dma.done.wait [#allocation6], 12384  }
  0x2a   :  { %1289 = vsyncadd [#allocation6], 4294954912  ;;  %v1022_v0 = vld [vmem:[#allocation5 + $0x74] ss:$8 sps:$4 sm:$0xff]   ;;  %v1024_v1 = vld [vmem:[#allocation5 + $0x70] ss:$8 sps:$4 sm:$0xff]  }
  0x2b   :  { %270 = vmatprep.subr.bf16.mxu0 %v1022_v0  ;;  %v1025_v2 = vld [vmem:[#allocation5 + $0x64] ss:$8 sps:$4 sm:$0xff]   ;;  %v1027_v3 = vld [vmem:[#allocation5 + $0x60] ss:$8 sps:$4 sm:$0xff]   ;;  %v1028_v4 = vld [vmem:[#allocation5 + $0x54] ss:$8 sps:$4 sm:$0xff]  }
  0x2c   :  { %271 = vmatpush1.bf16.msra.mxu0 %v1024_v1  ;;  %v1030_v5 = vld [vmem:[#allocation5 + $0x50] ss:$8 sps:$4 sm:$0xff]   ;;  %v1031_v6 = vld [vmem:[#allocation5 + $0x44] ss:$8 sps:$4 sm:$0xff]   ;;  %v1033_v7 = vld [vmem:[#allocation5 + $0x40] ss:$8 sps:$4 sm:$0xff]  }
  0x2d   :  { %272 = vmatprep.subr.bf16.mxu0 %v1025_v2  ;;  %v1034_v8 = vld [vmem:[#allocation5 + $0x34] ss:$8 sps:$4 sm:$0xff]   ;;  %v1036_v9 = vld [vmem:[#allocation5 + $0x30] ss:$8 sps:$4 sm:$0xff]   ;;  %v1037_v10 = vld [vmem:[#allocation5 + $0x24] ss:$8 sps:$4 sm:$0xff]  }
  0x2e   :  { %v1039_v11 = vld [vmem:[#allocation5 + $0x20] ss:$8 sps:$4 sm:$0xff]   ;;  %v1040_v12 = vld [vmem:[#allocation5 + $0x14] ss:$8 sps:$4 sm:$0xff]   ;;  %v1069_v14 = vld [vmem:[#allocation5 + $0x170] ss:$8 sps:$4 sm:$0xff]  }
  0x2f   :  { %v1067_v13 = vld [vmem:[#allocation5 + $0x174] ss:$8 sps:$4 sm:$0xff]   ;;  %v1042_v15 = vld [vmem:[#allocation5 + $0x10] ss:$8 sps:$4 sm:$0xff]   ;;  %v1073_v16 = vld [vmem:[#allocation5 + $0x164] ss:$8 sps:$4 sm:$0xff]  }
  0x30   :  { %273 = vmatpush1.bf16.msra.mxu0 %v1027_v3  ;;  %533 = vmatprep.subr.bf16.mxu1 %v1067_v13  ;;  %v1075_v17 = vld [vmem:[#allocation5 + $0x160] ss:$8 sps:$4 sm:$0xff]   ;;  %v1043_v18 = vld [vmem:[#allocation5 + $0x4] ss:$8 sps:$4 sm:$0xff]   ;;  %v63_v20 = vld [vmem:[#allocation2 + $0x18] sm:$0xff]  ;;  %s1303_s0 = smov [#allocation8]  }
  0x31   :  { %274 = vmatprep.subr.bf16.mxu0 %v1028_v4  ;;  %534 = vmatpush1.bf16.msra.mxu1 %v1069_v14  ;;  %v61_v19 = vld [vmem:[#allocation2 + $0x8] sm:$0xff]  ;;  %v1079_v23 = vld [vmem:[#allocation5 + $0x154] ss:$8 sps:$4 sm:$0xff]   ;;  %v1081_v24 = vld [vmem:[#allocation5 + $0x150] ss:$8 sps:$4 sm:$0xff]   ;;  %s858_s2 = sshll.u32 %s1303_s0, 4  ;;  %s859_s2 = int_to_ptr.vmem [resolvable:$true] %s858_s2 }
  0x32   :  { %535 = vmatprep.subr.bf16.mxu1 %v1073_v16  ;;  %v1348_v21 = vpack.c.bf16 %v63_v20, %v61_v19  ;;  %v1045_v22 = vld [vmem:[#allocation5] ss:$8 sps:$4 sm:$0xff]   ;;  %v1046_v25 = vld [vmem:[#allocation5 + $0xf4] ss:$8 sps:$4 sm:$0xff]   ;;  %v1048_v26 = vld [vmem:[#allocation5 + $0xf0] ss:$8 sps:$4 sm:$0xff]   ;;  %p1231_p2 = scmp.lt.s32.totalorder %s859_s2, %s859_s2 }
  0x33   :  { %v1085_v27 = vld [vmem:[#allocation5 + $0x144] ss:$8 sps:$4 sm:$0xff]   ;;  %v1087_v29 = vld [vmem:[#allocation5 + $0x140] ss:$8 sps:$4 sm:$0xff]   ;;  %v1091_v30 = vld [vmem:[#allocation5 + $0x134] ss:$8 sps:$4 sm:$0xff]  }
  0x34   :  { %275 = vmatpush1.bf16.msra.mxu0 %v1030_v5  ;;  %302 = vmatprep.mubr.bf16.mxu0 %v1348_v21  ;;  %v1049_v28 = vld [vmem:[#allocation5 + $0xe4] ss:$8 sps:$4 sm:$0xff]   ;;  %v1051_v31 = vld [vmem:[#allocation5 + $0xe0] ss:$8 sps:$4 sm:$0xff]   ;;  %v1052_v32 = vld [vmem:[#allocation5 + $0xd4] ss:$8 sps:$4 sm:$0xff]  }
  0x35   :  { %276 = vmatprep.subr.bf16.mxu0 %v1031_v6  ;;  %536 = vmatpush1.bf16.msra.mxu1 %v1075_v17  ;;  %v1093_v33 = vld [vmem:[#allocation5 + $0x130] ss:$8 sps:$4 sm:$0xff]   ;;  %v1097_v34 = vld [vmem:[#allocation5 + $0x124] ss:$8 sps:$4 sm:$0xff]   ;;  %v1099_v37 = vld [vmem:[#allocation5 + $0x120] ss:$8 sps:$4 sm:$0xff]  }
  0x36   :  { %537 = vmatprep.subr.bf16.mxu1 %v1079_v23  ;;  %565 = vmatprep.mubr.bf16.mxu1 %v1348_v21  ;;  %v1054_v35 = vld [vmem:[#allocation5 + $0xd0] ss:$8 sps:$4 sm:$0xff]   ;;  %v1055_v36 = vld [vmem:[#allocation5 + $0xc4] ss:$8 sps:$4 sm:$0xff]   ;;  %v1103_v38 = vld [vmem:[#allocation5 + $0x114] ss:$8 sps:$4 sm:$0xff]  }
  0x37   :  { %v1057_v39 = vld [vmem:[#allocation5 + $0xc0] ss:$8 sps:$4 sm:$0xff]   ;;  %v1058_v40 = vld [vmem:[#allocation5 + $0xb4] ss:$8 sps:$4 sm:$0xff]   ;;  %v1105_v41 = vld [vmem:[#allocation5 + $0x110] ss:$8 sps:$4 sm:$0xff]  }
  0x38   :  { %277 = vmatpush1.bf16.msra.mxu0 %v1033_v7  ;;  %v1109_v42 = vld [vmem:[#allocation5 + $0x104] ss:$8 sps:$4 sm:$0xff]   ;;  %v1060_v43 = vld [vmem:[#allocation5 + $0xb0] ss:$8 sps:$4 sm:$0xff]   ;;  %v1111_v45 = vld [vmem:[#allocation5 + $0x100] ss:$8 sps:$4 sm:$0xff]  }
  0x39   :  { %278 = vmatprep.subr.bf16.mxu0 %v1034_v8  ;;  %538 = vmatpush1.bf16.msra.mxu1 %v1081_v24  ;;  %v1061_v44 = vld [vmem:[#allocation5 + $0xa4] ss:$8 sps:$4 sm:$0xff]   ;;  %v1115_v46 = vld [vmem:[#allocation5 + $0x1f4] ss:$8 sps:$4 sm:$0xff]   ;;  %v1063_v47 = vld [vmem:[#allocation5 + $0xa0] ss:$8 sps:$4 sm:$0xff]  }
  0x3a   :  { %539 = vmatprep.subr.bf16.mxu1 %v1085_v27  ;;  %v1064_v48 = vld [vmem:[#allocation5 + $0x94] ss:$8 sps:$4 sm:$0xff]   ;;  %v1117_v49 = vld [vmem:[#allocation5 + $0x1f0] ss:$8 sps:$4 sm:$0xff]   ;;  %v1121_v50 = vld [vmem:[#allocation5 + $0x1e4] ss:$8 sps:$4 sm:$0xff]  }
  0x3b   :  { %v1066_v51 = vld [vmem:[#allocation5 + $0x90] ss:$8 sps:$4 sm:$0xff]   ;;  %v1070_v52 = vld [vmem:[#allocation5 + $0x84] ss:$8 sps:$4 sm:$0xff]   ;;  %v1123_v53 = vld [vmem:[#allocation5 + $0x1e0] ss:$8 sps:$4 sm:$0xff]  }
  0x3c   :  { %279 = vmatpush1.bf16.msra.mxu0 %v1036_v9  ;;  %v1127_v54 = vld [vmem:[#allocation5 + $0x1d4] ss:$8 sps:$4 sm:$0xff]   ;;  %v1072_v55 = vld [vmem:[#allocation5 + $0x80] ss:$8 sps:$4 sm:$0xff]   ;;  %v1129_v59 = vld [vmem:[#allocation5 + $0x1d0] ss:$8 sps:$4 sm:$0xff]  }
  0x3d   :  { %280 = vmatprep.subr.bf16.mxu0 %v1037_v10  ;;  %540 = vmatpush1.bf16.msra.mxu1 %v1087_v29  ;;  %v60_v56 = vld [vmem:[#allocation2] sm:$0xff]  ;;  %v62_v57 = vld [vmem:[#allocation2 + $0x10] sm:$0xff]  ;;  %s1226_s13 = scalar_lea.vmem %s859_s2, 256 }
  0x3e   :  { %541 = vmatprep.subr.bf16.mxu1 %v1091_v30  ;;  %v1078_v58 = vld [vmem:[#allocation5 + $0x274] ss:$8 sps:$4 sm:$0xff]   ;;  %v1133_v60 = vld [vmem:[#allocation5 + $0x1c4] ss:$8 sps:$4 sm:$0xff]   ;;  %v1352_v61 = vpack.c.bf16 %v62_v57, %v60_v56  ;;  %v1076_v62 = vld [vmem:[#allocation5 + $0x270] ss:$8 sps:$4 sm:$0xff]   ;;  %p1227_p1 = scmp.ne.s32.totalorder %s859_s2, %s1226_s13  ;;  %p1232_p3 = scmp.lt.s32.totalorder %s1226_s13, %s1226_s13 }
  0x3f   :  { %v1084_v63 = vld [vmem:[#allocation5 + $0x264] ss:$8 sps:$4 sm:$0xff]   ;;  %v1135_v0 = vld [vmem:[#allocation5 + $0x1c0] ss:$8 sps:$4 sm:$0xff]   ;;  %v1139_v1 = vld [vmem:[#allocation5 + $0x1b4] ss:$8 sps:$4 sm:$0xff]  }
  0x40   :  { %281 = vmatpush1.bf16.msra.mxu0 %v1039_v11  ;;  %v1082_v2 = vld [vmem:[#allocation5 + $0x260] ss:$8 sps:$4 sm:$0xff]   ;;  %v1141_v3 = vld [vmem:[#allocation5 + $0x1b0] ss:$8 sps:$4 sm:$0xff]   ;;  %v1090_v4 = vld [vmem:[#allocation5 + $0x254] ss:$8 sps:$4 sm:$0xff]   ;;  %p1233_p4 = por %p1232_p3, %p1231_p2 }
  0x41   :  { %282 = vmatprep.subr.bf16.mxu0 %v1040_v12  ;;  %542 = vmatpush1.bf16.msra.mxu1 %v1093_v33  ;;  %v1145_v5 = vld [vmem:[#allocation5 + $0x1a4] ss:$8 sps:$4 sm:$0xff]   ;;  %v1088_v6 = vld [vmem:[#allocation5 + $0x250] ss:$8 sps:$4 sm:$0xff]   ;;  %v1147_v7 = vld [vmem:[#allocation5 + $0x1a0] ss:$8 sps:$4 sm:$0xff]  }
  0x42   :  { %543 = vmatprep.subr.bf16.mxu1 %v1097_v34  ;;  %v1096_v8 = vld [vmem:[#allocation5 + $0x244] ss:$8 sps:$4 sm:$0xff]   ;;  %v1151_v9 = vld [vmem:[#allocation5 + $0x194] ss:$8 sps:$4 sm:$0xff]   ;;  %v1094_v10 = vld [vmem:[#allocation5 + $0x240] ss:$8 sps:$4 sm:$0xff]   ;;  %p1234_p5 = pnand %p1233_p4, %p1227_p1 }
  0x43   :  { %v1153_v11 = vld [vmem:[#allocation5 + $0x190] ss:$8 sps:$4 sm:$0xff]   ;;  %v1102_v12 = vld [vmem:[#allocation5 + $0x234] ss:$8 sps:$4 sm:$0xff]   ;;  %v1157_v13 = vld [vmem:[#allocation5 + $0x184] ss:$8 sps:$4 sm:$0xff]  }
  0x44   :  { %283 = vmatpush1.bf16.msra.mxu0 %v1042_v15  ;;  %v1100_v14 = vld [vmem:[#allocation5 + $0x230] ss:$8 sps:$4 sm:$0xff]   ;;  %v1159_v15 = vld [vmem:[#allocation5 + $0x180] ss:$8 sps:$4 sm:$0xff]   ;;  %v1108_v16 = vld [vmem:[#allocation5 + $0x224] ss:$8 sps:$4 sm:$0xff]  }
  0x45   :  { %284 = vmatprep.subr.bf16.mxu0 %v1043_v18  ;;  %544 = vmatpush1.bf16.msra.mxu1 %v1099_v37  ;;  %v1106_v17 = vld [vmem:[#allocation5 + $0x220] ss:$8 sps:$4 sm:$0xff]   ;;  %v1114_v18 = vld [vmem:[#allocation5 + $0x214] ss:$8 sps:$4 sm:$0xff]   ;;  %v1112_v19 = vld [vmem:[#allocation5 + $0x210] ss:$8 sps:$4 sm:$0xff]  }
  0x46   :  { %545 = vmatprep.subr.bf16.mxu1 %v1103_v38  ;;  %v1120_v20 = vld [vmem:[#allocation5 + $0x204] ss:$8 sps:$4 sm:$0xff]   ;;  %v1124_v23 = vld [vmem:[#allocation5 + $0x2f0] ss:$8 sps:$4 sm:$0xff]   ;;  %v1142_v29 = vld [vmem:[#allocation5 + $0x2c0] ss:$8 sps:$4 sm:$0xff]   ;;  %v100_v38 = vlaneseq }
  0x47   :  { %v1132_v24 = vld [vmem:[#allocation5 + $0x2e4] ss:$8 sps:$4 sm:$0xff]   ;;  %v1136_v27 = vld [vmem:[#allocation5 + $0x2d0] ss:$8 sps:$4 sm:$0xff]   ;;  %v1150_v30 = vld [vmem:[#allocation5 + $0x2b4] ss:$8 sps:$4 sm:$0xff]  }
  0x48   :  { %285 = vmatpush1.bf16.msra.mxu0 %v1045_v22  ;;  %v1126_v22 = vld [vmem:[#allocation5 + $0x2f4] ss:$8 sps:$4 sm:$0xff]   ;;  %v1154_v33 = vld [vmem:[#allocation5 + $0x2a0] ss:$8 sps:$4 sm:$0xff]  }
  0x49   :  { %286 = vmatprep.subr.bf16.mxu0 %v1046_v25  ;;  %546 = vmatpush1.bf16.msra.mxu1 %v1105_v41  ;;  %v1130_v25 = vld [vmem:[#allocation5 + $0x2e0] ss:$8 sps:$4 sm:$0xff]   ;;  %v1162_v34 = vld [vmem:[#allocation5 + $0x294] ss:$8 sps:$4 sm:$0xff]  }
  0x4a   :  { %547 = vmatprep.subr.bf16.mxu1 %v1109_v42  ;;  %v1163_v37 = vld [vmem:[#allocation5 + $0x280] ss:$8 sps:$4 sm:$0xff]  }
  0x4b   :  { %v98_v41 = vld [vmem:[#allocation7] sm:$0x3] }
  0x4c   :  { %287 = vmatpush2.bf16.msra.mxu0 %v1048_v26  ;;  %v1138_v26 = vld [vmem:[#allocation5 + $0x2d4] ss:$8 sps:$4 sm:$0xff]  }
  0x4d   :  { %288 = vmatprep.subr.bf16.mxu0 %v1049_v28  ;;  %548 = vmatpush1.bf16.msra.mxu1 %v1111_v45  ;;  %v1144_v28 = vld [vmem:[#allocation5 + $0x2c4] ss:$8 sps:$4 sm:$0xff]  }
  0x4e   :  { %549 = vmatprep.subr.bf16.mxu1 %v1115_v46 }
  0x50   :  { %289 = vmatpush2.bf16.msra.mxu0 %v1051_v31  ;;  %v1148_v31 = vld [vmem:[#allocation5 + $0x2b0] ss:$8 sps:$4 sm:$0xff]  }
  0x51   :  { %290 = vmatprep.subr.bf16.mxu0 %v1052_v32  ;;  %550 = vmatpush2.bf16.msra.mxu1 %v1117_v49  ;;  %v1156_v32 = vld [vmem:[#allocation5 + $0x2a4] ss:$8 sps:$4 sm:$0xff]  }
  0x52   :  { %551 = vmatprep.subr.bf16.mxu1 %v1121_v50 }
  0x54   :  { %291 = vmatpush2.bf16.msra.mxu0 %v1054_v35  ;;  %v1160_v35 = vld [vmem:[#allocation5 + $0x290] ss:$8 sps:$4 sm:$0xff]  }
  0x55   :  { %292 = vmatprep.subr.bf16.mxu0 %v1055_v36  ;;  %552 = vmatpush2.bf16.msra.mxu1 %v1123_v53  ;;  %v1165_v36 = vld [vmem:[#allocation5 + $0x284] ss:$8 sps:$4 sm:$0xff]  }
  0x56   :  { %553 = vmatprep.subr.bf16.mxu1 %v1127_v54 }
  0x58   :  { %293 = vmatpush2.bf16.msra.mxu0 %v1057_v39  ;;  %v101_v39 = vshrl.u32 %v100_v38, 7 }
  0x59   :  { %294 = vmatprep.subr.bf16.mxu0 %v1058_v40  ;;  %554 = vmatpush2.bf16.msra.mxu1 %v1129_v59 }
  0x5a   :  { %555 = vmatprep.subr.bf16.mxu1 %v1133_v60  ;;  %v102_v40 = vsub.s32 0, %v101_v39  ;;  %v106_v42 = vsub.s32 1, %v101_v39 }
  0x5c   :  { %295 = vmatpush2.bf16.msra.mxu0 %v1060_v43  ;;  %v103_v43 = vrot.slane %v98_v41, %v102_v40 }
  0x5d   :  { %296 = vmatprep.subr.bf16.mxu0 %v1061_v44  ;;  %556 = vmatpush2.bf16.msra.mxu1 %v1135_v0  ;;  %v107_v44 = vrot.slane %v98_v41, %v106_v42 }
  0x5e   :  { %557 = vmatprep.subr.bf16.mxu1 %v1139_v1 }
  0x60   :  { %297 = vmatpush2.bf16.msra.mxu0 %v1063_v47 }
  0x61   :  { %298 = vmatprep.subr.bf16.mxu0 %v1064_v48  ;;  %558 = vmatpush2.bf16.msra.mxu1 %v1141_v3 }
  0x62   :  { %559 = vmatprep.subr.bf16.mxu1 %v1145_v5 }
  0x64   :  { %299 = vmatpush2.bf16.msra.mxu0 %v1066_v51 }
  0x65   :  { %300 = vmatprep.subr.bf16.mxu0 %v1070_v52  ;;  %560 = vmatpush2.bf16.msra.mxu1 %v1147_v7 }
  0x66   :  { %561 = vmatprep.subr.bf16.mxu1 %v1151_v9 }
  0x68   :  { %301 = vmatpush2.bf16.msra.mxu0 %v1072_v55 }
  0x69   :  { %796 = vmatprep.subr.bf16.mxu0 %v1078_v58  ;;  %562 = vmatpush2.bf16.msra.mxu1 %v1153_v11 }
  0x6a   :  { %563 = vmatprep.subr.bf16.mxu1 %v1157_v13 }
  0x6b   :  { %303 = vmatmul.mubr.bf16.vlgmr.msra.gmra.mxu0 %v1352_v61 }
  0x6c   :  { %797 = vmatpush1.bf16.msra.mxu0 %v1076_v62  ;;  %828 = vmatprep.mubr.bf16.mxu0 %v1348_v21  ;;  %v1118_v21 = vld [vmem:[#allocation5 + $0x200] ss:$8 sps:$4 sm:$0xff]  }
  0x6d   :  { %798 = vmatprep.subr.bf16.mxu0 %v1084_v63  ;;  %564 = vmatpush2.bf16.msra.mxu1 %v1159_v15 }
  0x70   :  { %799 = vmatpush1.bf16.msra.mxu0 %v1082_v2  ;;  %566 = vmatmul.mubr.bf16.vlgmr.msra.gmra.mxu1 %v1352_v61 }
  0x71   :  { %800 = vmatprep.subr.bf16.mxu0 %v1090_v4 }
  0x74   :  { %801 = vmatpush1.bf16.msra.mxu0 %v1088_v6 }
  0x75   :  { %802 = vmatprep.subr.bf16.mxu0 %v1096_v8 }
  0x78   :  { %803 = vmatpush1.bf16.msra.mxu0 %v1094_v10 }
  0x79   :  { %804 = vmatprep.subr.bf16.mxu0 %v1102_v12 }
  0x7c   :  { %805 = vmatpush1.bf16.msra.mxu0 %v1100_v14 }
  0x7d   :  { %806 = vmatprep.subr.bf16.mxu0 %v1108_v16 }
  0x80   :  { %807 = vmatpush1.bf16.msra.mxu0 %v1106_v17 }
  0x81   :  { %808 = vmatprep.subr.bf16.mxu0 %v1114_v18 }
  0x84   :  { %809 = vmatpush1.bf16.msra.mxu0 %v1112_v19 }
  0x85   :  { %810 = vmatprep.subr.bf16.mxu0 %v1120_v20 }
  0x88   :  { %811 = vmatpush1.bf16.msra.mxu0 %v1118_v21 }
  0x89   :  { %812 = vmatprep.subr.bf16.mxu0 %v1126_v22 }
  0x8c   :  { %813 = vmatpush2.bf16.msra.mxu0 %v1124_v23 }
  0x8d   :  { %814 = vmatprep.subr.bf16.mxu0 %v1132_v24 }
  0x90   :  { %815 = vmatpush2.bf16.msra.mxu0 %v1130_v25 }
  0x91   :  { %816 = vmatprep.subr.bf16.mxu0 %v1138_v26 }
  0x94   :  { %817 = vmatpush2.bf16.msra.mxu0 %v1136_v27 }
  0x95   :  { %818 = vmatprep.subr.bf16.mxu0 %v1144_v28 }
  0x98   :  { %819 = vmatpush2.bf16.msra.mxu0 %v1142_v29 }
  0x99   :  { %820 = vmatprep.subr.bf16.mxu0 %v1150_v30 }
  0x9c   :  { %821 = vmatpush2.bf16.msra.mxu0 %v1148_v31 }
  0x9d   :  { %822 = vmatprep.subr.bf16.mxu0 %v1156_v32 }
  0xa0   :  { %823 = vmatpush2.bf16.msra.mxu0 %v1154_v33 }
  0xa1   :  { %824 = vmatprep.subr.bf16.mxu0 %v1162_v34 }
  0xa4   :  { %825 = vmatpush2.bf16.msra.mxu0 %v1160_v35 }
  0xa5   :  { %826 = vmatprep.subr.bf16.mxu0 %v1165_v36 }
  0xa8   :  { %827 = vmatpush2.bf16.msra.mxu0 %v1163_v37 }
  0xab   :  { %829 = vmatmul.mubr.bf16.vlgmr.msra.gmra.mxu0 %v1352_v61 }
 0x12b   :  { %v304_v45 = vpop.f32.mrf.mxu0 }
 0x12c   :  { %v305_v46 = vadd.f32 %v304_v45, %v103_v43 }
 0x12d   :  { %v306_v47 = vpop.f32.mrf.mxu0 }
 0x12e   :  { %v307_v48 = vadd.f32 %v306_v47, %v107_v44 }
 0x12f   :  { %v308_v49 = vpop.f32.mrf.mxu0 }
 0x130   :  { %v1004_v50 = vpack.c.bf16 %v307_v48, %v305_v46  ;;  %v309_v52 = vadd.f32 %v308_v49, %v103_v43 }
 0x131   :  { %v310_v51 = vpop.f32.mrf.mxu0 }
 0x132   :  { %325 = vst [vmem:[#allocation8] sm:$0xff] %v1004_v50  ;;  %v311_v53 = vadd.f32 %v310_v51, %v107_v44 }
 0x134   :  { %v1005_v54 = vpack.c.bf16 %v311_v53, %v309_v52 }
 0x136   :  { %326 = vst [vmem:[#allocation8 + $0x8] sm:$0xff] %v1005_v54 }
 0x137   :  { %1237 = shalt.err (!%p1234_p5)
}
 0x138   :  { %864 = dma.vmem_to_hbm [thread:$0]  %s859_s2, 256, %s1379_s3, [#allocation4], %s1295_s21, %s1295_s21, %s1296_s22   ;;  %v361_v55 = vld [vmem:[#allocation7 + $0x2] sm:$0x3]  ;;  %v567_v58 = vpop.f32.mrf.mxu1 }
 0x139   :  { %v366_v56 = vrot.slane %v361_v55, %v102_v40  ;;  %v370_v57 = vrot.slane %v361_v55, %v106_v42  ;;  %s1304_s16 = smov [#allocation9]  }
 0x13a   :  { %v569_v60 = vpop.f32.mrf.mxu1  ;;  %s870_s17 = sshll.u32 %s1304_s16, 4  ;;  %s871_s17 = int_to_ptr.vmem [resolvable:$true] %s870_s17 }
 0x13b   :  { %v568_v59 = vadd.f32 %v567_v58, %v366_v56  ;;  %v570_v61 = vadd.f32 %v569_v60, %v370_v57  ;;  %s1246_s18 = scalar_lea.vmem %s871_s17, 256  ;;  %p1251_p7 = scmp.lt.s32.totalorder %s871_s17, %s871_s17 }
 0x13c   :  { %v571_v62 = vpop.f32.mrf.mxu1  ;;  %p1247_p6 = scmp.ne.s32.totalorder %s871_s17, %s1246_s18  ;;  %p1252_p8 = scmp.lt.s32.totalorder %s1246_s18, %s1246_s18 }
 0x13d   :  { %v1006_v63 = vpack.c.bf16 %v570_v61, %v568_v59  ;;  %v572_v0 = vadd.f32 %v571_v62, %v366_v56 }
 0x13e   :  { %v573_v1 = vpop.f32.mrf.mxu1  ;;  %p1253_p9 = por %p1252_p8, %p1251_p7 }
 0x13f   :  { %588 = vst [vmem:[#allocation9] sm:$0xff] %v1006_v63  ;;  %v574_v2 = vadd.f32 %v573_v1, %v370_v57 }
 0x140   :  { %p1254_p10 = pnand %p1253_p9, %p1247_p6 }
 0x141   :  { %v1007_v3 = vpack.c.bf16 %v574_v2, %v572_v0 }
 0x143   :  { %589 = vst [vmem:[#allocation9 + $0x8] sm:$0xff] %v1007_v3 }
 0x144   :  { %1257 = shalt.err (!%p1254_p10)
}
 0x145   :  { %876 = dma.vmem_to_hbm [thread:$0]  %s871_s17, 256, %s1380_s4, [#allocation10], %s1295_s21, %s1295_s21, %s1296_s22   ;;  %v624_v4 = vld [vmem:[#allocation7 + $0x4] sm:$0x3] }
 0x146   :  { %v629_v5 = vrot.slane %v624_v4, %v102_v40  ;;  %v633_v6 = vrot.slane %v624_v4, %v106_v42  ;;  %s1305_s20 = smov [#allocation11]  }
 0x147   :  { %s882_s23 = sshll.u32 %s1305_s20, 4  ;;  %s883_s23 = int_to_ptr.vmem [resolvable:$true] %s882_s23 }
 0x148   :  { %s1266_s24 = scalar_lea.vmem %s883_s23, 256  ;;  %p1271_p12 = scmp.lt.s32.totalorder %s883_s23, %s883_s23 }
 0x149   :  { %p1267_p11 = scmp.ne.s32.totalorder %s883_s23, %s1266_s24  ;;  %p1272_p13 = scmp.lt.s32.totalorder %s1266_s24, %s1266_s24 }
 0x14b   :  { %p1273_p0 = por %p1272_p13, %p1271_p12 }
 0x14d   :  { %p1274_p1 = pnand %p1273_p0, %p1267_p11 }
 0x16b   :  { %v830_v7 = vpop.f32.mrf.mxu0 }
 0x16c   :  { %v831_v9 = vadd.f32 %v830_v7, %v629_v5 }
 0x16d   :  { %v832_v8 = vpop.f32.mrf.mxu0 }
 0x16e   :  { %v833_v10 = vadd.f32 %v832_v8, %v633_v6 }
 0x16f   :  { %v834_v11 = vpop.f32.mrf.mxu0 }
 0x170   :  { %v1008_v12 = vpack.c.bf16 %v833_v10, %v831_v9  ;;  %v835_v14 = vadd.f32 %v834_v11, %v629_v5 }
 0x171   :  { %v836_v13 = vpop.f32.mrf.mxu0 }
 0x172   :  { %851 = vst [vmem:[#allocation11] sm:$0xff] %v1008_v12  ;;  %v837_v15 = vadd.f32 %v836_v13, %v633_v6 }
 0x174   :  { %v1009_v16 = vpack.c.bf16 %v837_v15, %v835_v14 }
 0x176   :  { %852 = vst [vmem:[#allocation11 + $0x8] sm:$0xff] %v1009_v16 }
 0x177   :  { %1277 = shalt.err (!%p1274_p1)
}
 0x178   :  { %888 = dma.vmem_to_hbm [thread:$0]  %s883_s23, 256, %s1381_s5, [#allocation10], %s1295_s21, %s1295_s21, %s1296_s22  }
 0x179   :  { %1290 = dma.done.wait [#allocation4], 256  }
 0x17a   :  { %1291 = vsyncadd [#allocation4], 4294967040 }
 0x17b   :  { %1292 = dma.done.wait [#allocation10], 512  }
 0x17c   :  { %1293 = vsyncadd [#allocation10], 4294966784 }
 0x17d   :  { %898 = vsyncpa [#allocation3], 1 }
 0x17e   :  { %899 = vsyncpa [#allocation6], 1 }
 0x17f   :  { %900 = vsyncpa [#allocation4], 1 }
 0x180   :  { %901 = vsyncpa [#allocation10], 1 }

</bundles_post_ra>
